<compile_context>
chip_gen: v7x
topology: tpu7x:2x2x1
jax: 0.10.0
libtpu: 0.0.40
codegen_flags: <defaults>
</compile_context>

<pallas_src>
import jax
import jax.numpy as jnp
from jax.experimental import pallas as pl
from jax.experimental.pallas import tpu as pltpu


def _round_up(x, m):
    return ((x + m - 1) // m) * m


def _resident(shape):
    # Whole-array VMEM-resident block (constant index_map).
    return pl.BlockSpec(shape, lambda i: (0, 0))


# ---------------------------------------------------------------------------
# Kernel A: row-major layout, x is (tb, nin), out is (tb, nout).
# ---------------------------------------------------------------------------
def _actor_rows_kernel(x_ref, w1_ref, b1_ref, w2_ref, b2_ref, w3_ref, b3_ref,
                       out_ref):
    x = x_ref[...]                                                # (tb, nin)
    h1 = jnp.maximum(
        jnp.dot(x, w1_ref[...], preferred_element_type=jnp.float32)
        + b1_ref[...], 0.0)                                       # (tb, hid)
    h2 = jnp.maximum(
        jnp.dot(h1, w2_ref[...], preferred_element_type=jnp.float32)
        + b2_ref[...], 0.0)                                       # (tb, hid)
    logits = (jnp.dot(h2, w3_ref[...], preferred_element_type=jnp.float32)
              + b3_ref[...])                                      # (tb, nout)
    # softmax(dim=-1) + 1e-8 (max-subtracted, matching PyTorch numerics)
    m = jnp.max(logits, axis=-1, keepdims=True)
    e = jnp.exp(logits - m)
    s = jnp.sum(e, axis=-1, keepdims=True)
    out_ref[...] = e / s + 1e-8


# ---------------------------------------------------------------------------
# Kernel B: batch-as-lanes layout, x is (nin, tb), out is (nout, tb).
# Weights are passed in PyTorch orientation (out_features, in_features) so the
# matmuls are plain jnp.dot with the 128-aligned batch tile as the lane dim.
# ---------------------------------------------------------------------------
def _actor_lanes_kernel(xt_ref, w1_ref, b1_ref, w2_ref, b2_ref, w3_ref, b3_ref,
                        out_ref):
    xt = xt_ref[...]                                              # (nin, tb)
    h1 = jnp.maximum(
        jnp.dot(w1_ref[...], xt, preferred_element_type=jnp.float32)
        + b1_ref[...], 0.0)                                       # (hid, tb)
    h2 = jnp.maximum(
        jnp.dot(w2_ref[...], h1, preferred_element_type=jnp.float32)
        + b2_ref[...], 0.0)                                       # (hid, tb)
    logits = (jnp.dot(w3_ref[...], h2, preferred_element_type=jnp.float32)
              + b3_ref[...])                                      # (nout, tb)
    # softmax over the feature (sublane) axis, per batch column.
    m = jnp.max(logits, axis=0, keepdims=True)
    e = jnp.exp(logits - m)
    s = jnp.sum(e, axis=0, keepdims=True)
    out_ref[...] = e / s + 1e-8


def actor_fnn_forward(state, params, *, block_rows=2048,
                      lanes_threshold=1024, lanes_block=1024):
    """state: (..., nin) float32 -> (..., nout) softmax probabilities + 1e-8."""
    nin = state.shape[-1]
    lead = state.shape[:-1]
    x = state.reshape(-1, nin).astype(jnp.float32)
    b = x.shape[0]

    hid = params["w1"].shape[1]
    nout = params["w3"].shape[1]

    compiler_params = pltpu.CompilerParams(
        dimension_semantics=("parallel",))  # megacore-shardable on v7x

    if b >= lanes_threshold:
        # ---------------- batch-as-lanes path (large batches) ----------------
        xt = x.T                                   # (nin, b): one amortized pass
        tb = min(lanes_block, _round_up(b, 128))   # lane-dim tile, 128-aligned
        if pl.cdiv(b, tb) == 1 and b >= 1024:
            # keep >= 2 parallel steps so both v7x TensorCores are used
            tb = _round_up(pl.cdiv(b, 2), 128)
        grid = (pl.cdiv(b, tb),)                   # boundary block masked by Pallas

        out = pl.pallas_call(
            _actor_lanes_kernel,
            out_shape=jax.ShapeDtypeStruct((nout, b), jnp.float32),
            grid_spec=pltpu.PrefetchScalarGridSpec(
                num_scalar_prefetch=0,
                grid=grid,
                in_specs=[
                    pl.BlockSpec((nin, tb), lambda i: (0, i)),   # x^T columns
                    _resident((hid, nin)),                       # W1 (torch layout)
                    _resident((hid, 1)),                         # b1 column
                    _resident((hid, hid)),                       # W2
                    _resident((hid, 1)),                         # b2
                    _resident((nout, hid)),                      # W3
                    _resident((nout, 1)),                        # b3
                ],
                out_specs=pl.BlockSpec((nout, tb), lambda i: (0, i)),
            ),
            compiler_params=compiler_params,
        )(xt,
          params["w1"].T, params["b1"].T,
          params["w2"].T, params["b2"].T,
          params["w3"].T, params["b3"].T)
        return out.T.reshape(lead + (nout,))

    # -------------------- row-major path (small / medium) --------------------
    if b <= block_rows:
        tb = _round_up(max(b, 1), 8)               # whole batch, one grid step
    else:
        tb = block_rows
    if pl.cdiv(b, tb) == 1 and b >= 1024:
        # keep >= 2 parallel steps for v7x's second TensorCore
        tb = _round_up(pl.cdiv(b, 2), 8)
    grid = (pl.cdiv(b, tb),)                       # no padding: Pallas masks the
                                                   # partial boundary block

    out = pl.pallas_call(
        _actor_rows_kernel,
        out_shape=jax.ShapeDtypeStruct((b, nout), jnp.float32),
        grid_spec=pltpu.PrefetchScalarGridSpec(
            num_scalar_prefetch=0,
            grid=grid,
            in_specs=[
                pl.BlockSpec((tb, nin), lambda i: (i, 0)),       # x rows
                _resident((nin, hid)),                           # W1^T
                _resident((1, hid)),                             # b1
                _resident((hid, hid)),                           # W2^T
                _resident((1, hid)),                             # b2
                _resident((hid, nout)),                          # W3^T
                _resident((1, nout)),                            # b3
            ],
            out_specs=pl.BlockSpec((tb, nout), lambda i: (i, 0)),
        ),
        compiler_params=compiler_params,
    )(x, params["w1"], params["b1"], params["w2"], params["b2"],
      params["w3"], params["b3"])

    return out.reshape(lead + (nout,))


def init_params(key, nin, nout, hid):
    """Deterministic init matching PyTorch nn.Linear shapes.

    PyTorch stores weight as (out_features, in_features) with
    U(-1/sqrt(in), 1/sqrt(in)) init; here weights are stored transposed
    (in, out) so the row-major kernel computes x @ W directly, and biases as
    (1, out) row vectors.  The lanes-path wrapper re-transposes them (tiny).
    """
    ks = jax.random.split(key, 6)

    def linear(kw, kb, fan_in, fan_out):
        bound = 1.0 / float(fan_in) ** 0.5
        w = jax.random.uniform(kw, (fan_out, fan_in), jnp.float32,
                               -bound, bound)
        bb = jax.random.uniform(kb, (fan_out,), jnp.float32, -bound, bound)
        return w.T, bb[None, :]

    w1, b1 = linear(ks[0], ks[1], nin, hid)
    w2, b2 = linear(ks[2], ks[3], hid, hid)
    w3, b3 = linear(ks[4], ks[5], hid, nout)
    return {"w1": w1, "b1": b1, "w2": w2, "b2": b2, "w3": w3, "b3": b3}


def actor_fnn_reference(state, params):
    """Pure-JAX reference (full f32 matmul precision) for correctness check."""
    hp = jax.lax.Precision.HIGHEST
    x = state.astype(jnp.float32)
    h1 = jax.nn.relu(jnp.dot(x, params["w1"], precision=hp) + params["b1"])
    h2 = jax.nn.relu(jnp.dot(h1, params["w2"], precision=hp) + params["b2"])
    logits = jnp.dot(h2, params["w3"], precision=hp) + params["b3"]
    return jax.nn.softmax(logits, axis=-1) + 1e-8


if __name__ == "__main__":
    nin, nout, hid = 16, 8, 32     # param = (nin, nout, hid)

    key = jax.random.PRNGKey(0)
    k_x, k_p, k_big = jax.random.split(key, 3)
    params = init_params(k_p, nin, nout, hid)

    # 1) Small batch: row-major path, whole batch in a single grid step.
    state = jax.random.normal(k_x, (8, nin), jnp.float32)
    probs = jax.block_until_ready(actor_fnn_forward(state, params))
    ref = actor_fnn_reference(state, params)
    assert probs.shape == (8, nout)
    assert jnp.allclose(probs, ref, rtol=1e-4, atol=1e-5)
    assert bool(jnp.all(probs > 0))

    # 2) Larger non-multiple batch (5*67 = 335 rows): exercises the
    #    batch-as-lanes kernel, a multi-step parallel grid and the masked
    #    boundary block (no wrapper padding).
    big = jax.random.normal(k_big, (5, 67, nin), jnp.float32)
    ref_big = actor_fnn_reference(big, params)
    probs_lanes = jax.block_until_ready(
        actor_fnn_forward(big, params, lanes_threshold=128, lanes_block=128))
    assert probs_lanes.shape == (5, 67, nout)
    assert jnp.allclose(probs_lanes, ref_big, rtol=1e-4, atol=1e-5)

    # 3) Same batch through the row-major path with a tiled grid + boundary.
    probs_rows = jax.block_until_ready(
        actor_fnn_forward(big, params, block_rows=128, lanes_threshold=10**9))
    assert probs_rows.shape == (5, 67, nout)
    assert jnp.allclose(probs_rows, ref_big, rtol=1e-4, atol=1e-5)

    print("KERNEL_OK")
</pallas_src>

<mosaic_0001>
module attributes {stable_mosaic.version = 11 : i64} {
  func.func @_actor_rows_kernel(%arg0: i32, %arg1: memref<8x16xf32, #tpu.memory_space<vmem>>, %arg2: memref<16x32xf32, #tpu.memory_space<vmem>>, %arg3: memref<1x32xf32, #tpu.memory_space<vmem>>, %arg4: memref<32x32xf32, #tpu.memory_space<vmem>>, %arg5: memref<1x32xf32, #tpu.memory_space<vmem>>, %arg6: memref<32x8xf32, #tpu.memory_space<vmem>>, %arg7: memref<1x8xf32, #tpu.memory_space<vmem>>, %arg8: memref<8x8xf32, #tpu.memory_space<vmem>>) attributes {dimension_semantics = [#tpu.dimension_semantics<parallel>], iteration_bounds = array<i64: 1>, scalar_prefetch = 0 : i64, scratch_operands = 0 : i64, tpu.core_type = #tpu.core_type<tc>, window_params = [{transform_indices = @transform_0, window_bounds = array<i64: 8, 16>}, {pipeline_mode = #tpu.pipeline_mode<synchronous>, transform_indices = @transform_1, window_bounds = array<i64: 16, 32>}, {pipeline_mode = #tpu.pipeline_mode<synchronous>, transform_indices = @transform_2, window_bounds = array<i64: 1, 32>}, {pipeline_mode = #tpu.pipeline_mode<synchronous>, transform_indices = @transform_3, window_bounds = array<i64: 32, 32>}, {pipeline_mode = #tpu.pipeline_mode<synchronous>, transform_indices = @transform_4, window_bounds = array<i64: 1, 32>}, {pipeline_mode = #tpu.pipeline_mode<synchronous>, transform_indices = @transform_5, window_bounds = array<i64: 32, 8>}, {pipeline_mode = #tpu.pipeline_mode<synchronous>, transform_indices = @transform_6, window_bounds = array<i64: 1, 8>}, {transform_indices = @transform_7, window_bounds = array<i64: 8, 8>}]} {
    %c0 = arith.constant 0 : index
    %c0_0 = arith.constant 0 : index
    %0 = vector.load %arg1[%c0, %c0_0] : memref<8x16xf32, #tpu.memory_space<vmem>>, vector<8x16xf32>
    %c0_1 = arith.constant 0 : index
    %c0_2 = arith.constant 0 : index
    %1 = vector.load %arg2[%c0_1, %c0_2] : memref<16x32xf32, #tpu.memory_space<vmem>>, vector<16x32xf32>
    %cst = arith.constant dense<0.000000e+00> : vector<8x32xf32>
    %2 = tpu.matmul %0, %1, %cst {dimension_numbers = #tpu.dot_dimension_numbers<[1], [0], [0], [1], [0, 0, 1, 1], [], []>} : vector<8x16xf32>, vector<16x32xf32>, vector<8x32xf32> -> vector<8x32xf32>
    %c0_3 = arith.constant 0 : index
    %c0_4 = arith.constant 0 : index
    %3 = vector.load %arg3[%c0_3, %c0_4] : memref<1x32xf32, #tpu.memory_space<vmem>>, vector<1x32xf32>
    %4 = vector.broadcast %3 : vector<1x32xf32> to vector<8x32xf32>
    %5 = arith.addf %2, %4 : vector<8x32xf32>
    %cst_5 = arith.constant 0.000000e+00 : f32
    %6 = vector.broadcast %cst_5 : f32 to vector<8x32xf32>
    %7 = arith.maximumf %5, %6 : vector<8x32xf32>
    %c0_6 = arith.constant 0 : index
    %c0_7 = arith.constant 0 : index
    %8 = vector.load %arg4[%c0_6, %c0_7] : memref<32x32xf32, #tpu.memory_space<vmem>>, vector<32x32xf32>
    %cst_8 = arith.constant dense<0.000000e+00> : vector<8x32xf32>
    %9 = tpu.matmul %7, %8, %cst_8 {dimension_numbers = #tpu.dot_dimension_numbers<[1], [0], [0], [1], [0, 0, 1, 1], [], []>} : vector<8x32xf32>, vector<32x32xf32>, vector<8x32xf32> -> vector<8x32xf32>
    %c0_9 = arith.constant 0 : index
    %c0_10 = arith.constant 0 : index
    %10 = vector.load %arg5[%c0_9, %c0_10] : memref<1x32xf32, #tpu.memory_space<vmem>>, vector<1x32xf32>
    %11 = vector.broadcast %10 : vector<1x32xf32> to vector<8x32xf32>
    %12 = arith.addf %9, %11 : vector<8x32xf32>
    %cst_11 = arith.constant 0.000000e+00 : f32
    %13 = vector.broadcast %cst_11 : f32 to vector<8x32xf32>
    %14 = arith.maximumf %12, %13 : vector<8x32xf32>
    %c0_12 = arith.constant 0 : index
    %c0_13 = arith.constant 0 : index
    %15 = vector.load %arg6[%c0_12, %c0_13] : memref<32x8xf32, #tpu.memory_space<vmem>>, vector<32x8xf32>
    %cst_14 = arith.constant dense<0.000000e+00> : vector<8x8xf32>
    %16 = tpu.matmul %14, %15, %cst_14 {dimension_numbers = #tpu.dot_dimension_numbers<[1], [0], [0], [1], [0, 0, 1, 1], [], []>} : vector<8x32xf32>, vector<32x8xf32>, vector<8x8xf32> -> vector<8x8xf32>
    %c0_15 = arith.constant 0 : index
    %c0_16 = arith.constant 0 : index
    %17 = vector.load %arg7[%c0_15, %c0_16] : memref<1x8xf32, #tpu.memory_space<vmem>>, vector<1x8xf32>
    %18 = vector.broadcast %17 : vector<1x8xf32> to vector<8x8xf32>
    %19 = arith.addf %16, %18 : vector<8x8xf32>
    %cst_17 = arith.constant dense<0xFF800000> : vector<8xf32>
    %20 = vector.multi_reduction <maximumf>, %19, %cst_17 [1] : vector<8x8xf32> to vector<8xf32>
    %21 = vector.shape_cast %20 : vector<8xf32> to vector<8x1xf32>
    %22 = vector.broadcast %21 : vector<8x1xf32> to vector<8x8xf32>
    %23 = arith.subf %19, %22 : vector<8x8xf32>
    %24 = math.exp %23 : vector<8x8xf32>
    %cst_18 = arith.constant dense<0.000000e+00> : vector<8xf32>
    %25 = vector.multi_reduction <add>, %24, %cst_18 [1] : vector<8x8xf32> to vector<8xf32>
    %26 = vector.shape_cast %25 : vector<8xf32> to vector<8x1xf32>
    %27 = vector.broadcast %26 : vector<8x1xf32> to vector<8x8xf32>
    %28 = arith.divf %24, %27 : vector<8x8xf32>
    %cst_19 = arith.constant 9.99999993E-9 : f32
    %29 = vector.broadcast %cst_19 : f32 to vector<8x8xf32>
    %30 = arith.addf %28, %29 : vector<8x8xf32>
    %c0_20 = arith.constant 0 : index
    %c0_21 = arith.constant 0 : index
    %31 = vector.load %arg8[%c0_20, %c0_21] : memref<8x8xf32, #tpu.memory_space<vmem>>, vector<8x8xf32>
    tpu.vector_store %arg8[%c0_20, %c0_21], %30 {strides = array<i32>} : memref<8x8xf32, #tpu.memory_space<vmem>>, vector<8x8xf32>,
    return
  }
  func.func @transform_0(%arg0: i32) -> (i32, i32) {
    %c0_i32 = arith.constant 0 : i32
    %c0_i32_0 = arith.constant 0 : i32
    return %arg0, %c0_i32 : i32, i32
  }
  func.func @transform_1(%arg0: i32) -> (i32, i32) {
    %c0_i32 = arith.constant 0 : i32
    %c0_i32_0 = arith.constant 0 : i32
    %c0_i32_1 = arith.constant 0 : i32
    return %c0_i32, %c0_i32_0 : i32, i32
  }
  func.func @transform_2(%arg0: i32) -> (i32, i32) {
    %c0_i32 = arith.constant 0 : i32
    %c0_i32_0 = arith.constant 0 : i32
    %c0_i32_1 = arith.constant 0 : i32
    return %c0_i32, %c0_i32_0 : i32, i32
  }
  func.func @transform_3(%arg0: i32) -> (i32, i32) {
    %c0_i32 = arith.constant 0 : i32
    %c0_i32_0 = arith.constant 0 : i32
    %c0_i32_1 = arith.constant 0 : i32
    return %c0_i32, %c0_i32_0 : i32, i32
  }
  func.func @transform_4(%arg0: i32) -> (i32, i32) {
    %c0_i32 = arith.constant 0 : i32
    %c0_i32_0 = arith.constant 0 : i32
    %c0_i32_1 = arith.constant 0 : i32
    return %c0_i32, %c0_i32_0 : i32, i32
  }
  func.func @transform_5(%arg0: i32) -> (i32, i32) {
    %c0_i32 = arith.constant 0 : i32
    %c0_i32_0 = arith.constant 0 : i32
    %c0_i32_1 = arith.constant 0 : i32
    return %c0_i32, %c0_i32_0 : i32, i32
  }
  func.func @transform_6(%arg0: i32) -> (i32, i32) {
    %c0_i32 = arith.constant 0 : i32
    %c0_i32_0 = arith.constant 0 : i32
    %c0_i32_1 = arith.constant 0 : i32
    return %c0_i32, %c0_i32_0 : i32, i32
  }
  func.func @transform_7(%arg0: i32) -> (i32, i32) {
    %c0_i32 = arith.constant 0 : i32
    %c0_i32_0 = arith.constant 0 : i32
    return %arg0, %c0_i32 : i32, i32
  }
}

</mosaic_0001>

<bundles_post_ra>
// kernel: tpu_custom_call.1
= control target key start
LH: loop header
LB: loop body
LE: loop exit
PB: predicated region body
PF: predicated region fallthrough
CT: control target
= control target key end

     0   :  { %12 = vsyncpa [#allocation3], 0  ;;  %s557_s0 = inlined_call_operand.hbm [shape: f32[8,16], index: 0, kind: input, shape index: {}]   ;;  %s558_s1 = inlined_call_operand.vmem [shape: f32[16,32], index: 1, kind: input, shape index: {}]   ;;  %s559_s2 = inlined_call_operand.vmem [shape: f32[1,32], index: 2, kind: input, shape index: {}]   ;;  %s560_s3 = inlined_call_operand.vmem [shape: f32[32,32], index: 3, kind: input, shape index: {}]   ;;  %s561_s4 = inlined_call_operand.vmem [shape: f32[1,32], index: 4, kind: input, shape index: {}]   ;;  %s562_s5 = inlined_call_operand.vmem [shape: f32[32,8], index: 5, kind: input, shape index: {}]   ;;  %s563_s6 = inlined_call_operand.vmem [shape: f32[1,8], index: 6, kind: input, shape index: {}]   ;;  %s564_s7 = inlined_call_operand.hbm [shape: f32[8,8], index: 7, kind: output, shape index: {}]  }
   0x1   :  { %13 = vsyncpa [#allocation4], 0  ;;  %s443_s24 = smov [#allocation2]   ;;  %s395_s28 = scalar_lea.hbm %s557_s0, 128 }
   0x2   :  { %s20_s25 = sshll.u32 %s443_s24, 4  ;;  %p396_p0 = scmp.ne.s32.totalorder %s557_s0, %s395_s28  ;;  %s21_s25 = int_to_ptr.vmem [resolvable:$true] %s20_s25 }
   0x3   :  { %p399_p1 = scmp.lt.u32.totalorder %s395_s28, %s557_s0 }
   0x5   :  { %p401_p2 = pnand %p399_p1, %p396_p0 }
   0x7   :  { %404 = shalt.err (!%p401_p2)
}
   0x8   :  { %s405_s10 = scalar_lea.vmem %s21_s25, 128  ;;  %p410_p4 = scmp.lt.s32.totalorder %s21_s25, %s21_s25 }
   0x9   :  { %p406_p3 = scmp.ne.s32.totalorder %s21_s25, %s405_s10  ;;  %p411_p5 = scmp.lt.s32.totalorder %s405_s10, %s405_s10 }
   0xb   :  { %p412_p6 = por %p411_p5, %p410_p4 }
   0xd   :  { %p413_p7 = pnand %p412_p6, %p406_p3 }
   0xf   :  { %416 = shalt.err (!%p413_p7)
}
  0x10   :  { %23 = dma.hbm_to_vmem [thread:$0]  %s557_s0, 128, %s21_s25, [#allocation3]  }
  0x11   :  { %439 = dma.done.wait [#allocation3], 128  }
  0x12   :  { %440 = vsyncadd [#allocation3], 4294967168  ;;  %v444_v0 = vmov 0.0|0.0   ;;  %vm445_vm0 = vmmov 0   ;;  %v446_v1 = vmov 0.0   ;;  %v40_v2 = vld [vmem:[%s558_s1] sm:$0xff] }
  0x13   :  { %371 = vmatprep.subr.bf16.mxu0 %v444_v0  ;;  %346 = vmatprep.mubr.msk.f32.mxu0 %vm445_vm0, %v446_v1  ;;  %v41_v3 = vld [vmem:[%s558_s1 + $0x8] sm:$0xff]  ;;  %v124_v5 = vld [vmem:[%s560_s3] sm:$0xff]  ;;  %vm49_vm1 = vcmask 130048   ;;  %v126_v9 = vld [vmem:[%s560_s3 + $0x10] sm:$0xff]  ;;  %vm135_vm2 = vcmask 261120   ;;  %vm294_vm3 = vcmask 64512  }
  0x14   :  { %374 = vmatprep.subr.bf16.mxu1 %v444_v0  ;;  %357 = vmatprep.mubr.msk.f32.mxu1 %vm445_vm0, %v446_v1  ;;  %v372_v4 = vpack.c.bf16 %v41_v3, %v40_v2  ;;  %v125_v6 = vld [vmem:[%s560_s3 + $0x8] sm:$0xff]  ;;  %v39_v8 = vld [vmem:[#allocation2] sm:$0xff]  ;;  %v127_v10 = vld [vmem:[%s560_s3 + $0x18] sm:$0xff] }
  0x15   :  { %v375_v7 = vpack.c.bf16 %v125_v6, %v124_v5  ;;  %v378_v11 = vpack.c.bf16 %v127_v10, %v126_v9  ;;  %v210_v12 = vld [vmem:[%s562_s5] sm:$0xff]  ;;  %v211_v13 = vld [vmem:[%s562_s5 + $0x8] sm:$0xff]  ;;  %v212_v20 = vld [vmem:[%s562_s5 + $0x10] sm:$0xff] }
  0x16   :  { %373 = vmatpush3.bf16.msra.mxu0 %v372_v4  ;;  %v381_v14 = vpack.c.bf16 %v211_v13, %v210_v12  ;;  %v323_v15 = vld [vmem:[%s559_s2] ss:$0 sm:$0xff]  ;;  %v213_v21 = vld [vmem:[%s562_s5 + $0x18] sm:$0xff] }
  0x17   :  { %376 = vmatpush3.bf16.msra.mxu1 %v375_v7  ;;  %380 = vmatprep.subr.bf16.mxu0 %v444_v0  ;;  %v384_v22 = vpack.c.bf16 %v213_v21, %v212_v20  ;;  %v325_v23 = vld [vmem:[%s561_s4] ss:$0 sm:$0xff]  ;;  %s447_s4 = smov [#allocation5]  }
  0x18   :  { %377 = vmatprep.subr.bf16.mxu1 %v444_v0  ;;  %v327_v28 = vld [vmem:[%s563_s6] ss:$0 sm:$0xff]  ;;  %s314_s5 = sshll.u32 %s447_s4, 4  ;;  %s315_s5 = int_to_ptr.vmem [resolvable:$true] %s314_s5 }
  0x19   :  { %347 = vmatmul.mubr.msk.f32.vlgmr.msra.gmra.mrb[0].mxu0 %vm49_vm1, %v39_v8  ;;  %s417_s6 = scalar_lea.vmem %s315_s5, 128  ;;  %p422_p9 = scmp.lt.s32.totalorder %s315_s5, %s315_s5 }
  0x1a   :  { %368 = vmatprep.mubr.msk.f32.mxu0 %vm445_vm0, %v446_v1  ;;  %382 = vmatpush3.bf16.msra.mxu0 %v381_v14  ;;  %p418_p8 = scmp.ne.s32.totalorder %s315_s5, %s417_s6  ;;  %p423_p10 = scmp.lt.s32.totalorder %s417_s6, %s417_s6 }
  0x1b   :  { %379 = vmatpush3.bf16.msra.mxu1 %v378_v11  ;;  %383 = vmatprep.subr.bf16.mxu0 %v444_v0 }
  0x1c   :  { %p424_p11 = por %p423_p10, %p422_p9 }
  0x1e   :  { %385 = vmatpush3.bf16.msra.mxu0 %v384_v22  ;;  %p425_p12 = pnand %p424_p11, %p418_p8 }
  0xec   :  { %v119_v16 = vpop.f32.mrb[0].mxu0 }
  0xed   :  { %v120_v17 = vadd.f32 %v323_v15, %v119_v16  ;;  %v348_v18 = vpop.f32.mrb[1].mxu0 }
  0xef   :  { %v123_v19 = vmax.f32 %v120_v17, 0.0 }
  0xf1   :  { %358 = vmatmul.mubr.msk.f32.vlgmr.msra.gmra.mrb[0].mxu1 %vm135_vm2, %v123_v19 }
 0x1c4   :  { %v205_v24 = vpop.f32.mrb[0].mxu1 }
 0x1c5   :  { %v206_v25 = vadd.f32 %v325_v23, %v205_v24  ;;  %v359_v26 = vpop.f32.mrb[1].mxu1 }
 0x1c7   :  { %v209_v27 = vmax.f32 %v206_v25, 0.0 }
 0x1c9   :  { %369 = vmatmul.mubr.msk.f32.vlgmr.msra.gmra.mrb[2].mxu0 %vm135_vm2, %v209_v27 }
 0x29c   :  { %v290_v29 = vpop.f32.mrb[2].mxu0 }
 0x29d   :  { %v291_v30 = vadd.f32 %v327_v28, %v290_v29  ;;  %v370_v31 = vpop.f32.mrb[3].mxu0 }
 0x29f   :  { %v295_v32 = vsel %vm294_vm3, %v291_v30, -inf }
 0x2a0   :  { %296 = vmax.xlane.f32.xlu0 %v295_v32 }
 0x32d   :  { %v297_v33 = vpop.xlane.xlu0 %296 }
 0x32e   :  { %v298_v34 = vsub.f32 %v291_v30, %v297_v33 }
 0x330   :  { %v299_v35 = vmul.f32 1.442695, %v298_v34 }
 0x332   :  { %391 = vpow2.f32 %v299_v35 }
 0x33c   :  { %v392_v36 = vpop.eup %391 }
 0x33d   :  { %v301_v37 = vsel %vm294_vm3, %v392_v36, 0.0 }
 0x33e   :  { %302 = vadd.xlane.f32.xlu0 %v301_v37 }
 0x3cb   :  { %v303_v38 = vpop.xlane.xlu0 %302 }
 0x3cc   :  { %393 = vrcp.f32 %v303_v38 }
 0x3d6   :  { %v394_v39 = vpop.eup %393 }
 0x3d7   :  { %v305_v40 = vmul.f32 %v394_v39, %v392_v36 }
 0x3d9   :  { %v306_v41 = vadd.f32 1e-08, %v305_v40 }
 0x3db   :  { %307 = vst.msk [vmem:[#allocation5] sm:$0xff] %vm294_vm3, %v306_v41 }
 0x3dc   :  { %428 = shalt.err (!%p425_p12)
}
 0x3dd   :  { %s429_s14 = scalar_lea.hbm %s564_s7, 128 }
 0x3de   :  { %p430_p13 = scmp.ne.s32.totalorder %s564_s7, %s429_s14  ;;  %p433_p0 = scmp.lt.u32.totalorder %s429_s14, %s564_s7 }
 0x3e0   :  { %p435_p1 = pnand %p433_p0, %p430_p13 }
 0x3e2   :  { %438 = shalt.err (!%p435_p1)
}
 0x3e3   :  { %317 = dma.vmem_to_hbm [thread:$0]  %s315_s5, 128, %s564_s7, [#allocation4]  }
 0x3e4   :  { %441 = dma.done.wait [#allocation4], 128  }
 0x3e5   :  { %442 = vsyncadd [#allocation4], 4294967168 }
 0x3e6   :  { %321 = vsyncpa [#allocation3], 1 }
 0x3e7   :  { %322 = vsyncpa [#allocation4], 1 }

</bundles_post_ra>
